<compile_context>
chip_gen: v7x
topology: tpu7x:2x2x1
jax: 0.10.0
libtpu: 0.0.40
codegen_flags: <defaults>
</compile_context>

<pallas_src>
import jax
import jax.numpy as jnp
import numpy as np
from jax import lax
from jax.experimental import pallas as pl
from jax.experimental.pallas import tpu as pltpu


def _bigru_head_kernel(x_ref, gtab_ref, bgx_ref, whh_ref, bhn_ref,
                       w1_ref, b1_ref, w2_ref, b2_ref, out_ref):
    SB = x_ref.shape[0]                # S * B flattened token positions
    V1 = gtab_ref.shape[0]             # vocab + 1
    G = whh_ref.shape[1]               # 6M packed gates [f_r|b_r|f_z|b_z|f_n|b_n]
    M = whh_ref.shape[0] // 2          # hidden size per direction
    S = out_ref.shape[0]
    B = SB // S

    # ---- Stage 1: in-kernel embedding lookup fused with the input projection.
    # onehot rows are exact 0/1 in f32, so this reproduces the gather exactly.
    xv = x_ref[...]                                               # (SB, 1) int32
    vcol = lax.broadcasted_iota(jnp.int32, (SB, V1), 1)
    onehot = (vcol == xv).astype(jnp.float32)                     # (SB, V+1)
    gx = jnp.dot(onehot, gtab_ref[...],
                 preferred_element_type=jnp.float32) + bgx_ref[...]   # (SB, 6M)

    # Pre-merge fwd/bwd time ordering once (paid S selects here, not on the serial
    # recurrence path): merged step i uses fwd lanes from timestep i and bwd lanes
    # from timestep S-1-i.
    is_fwd = (lax.broadcasted_iota(jnp.int32, (B, G), 1) % (2 * M)) < M
    gx_rows = [gx[i * B:(i + 1) * B] for i in range(S)]           # static slices
    gx_m = [jnp.where(is_fwd, gx_rows[i], gx_rows[S - 1 - i]) for i in range(S)]

    # Loop-invariant loads.
    whh = whh_ref[...]                 # bf16 (2M, 6M) block-diag [fwd | bwd] hidden weights
    bhn = bhn_ref[...]                 # f32  (1, 2M)  [bhh_n_fwd | bhh_n_bwd]

    # ---- Stage 2: merged fwd/bwd recurrence, statically unrolled (S is small/static).
    # h carries [h_fwd(t=i) | h_bwd(t=S-1-i)] packed as (B, 2M) in f32.
    h = jnp.zeros((B, 2 * M), jnp.float32)
    pooled_rows = []                   # per-step max over the "batch" axis, kept in vregs
    for i in range(S):
        gxt = gx_m[i]                                             # (B, 6M)
        gh = jnp.dot(h.astype(whh.dtype), whh,
                     preferred_element_type=jnp.float32)          # (B, 6M) bf16 MXU, f32 acc
        rz = jax.nn.sigmoid(gxt[:, :4 * M] + gh[:, :4 * M])       # (B, 4M) f32
        r = rz[:, :2 * M]
        z = rz[:, 2 * M:]
        n = jnp.tanh(gxt[:, 4 * M:] + r * (gh[:, 4 * M:] + bhn))  # (B, 2M) f32
        h = (1.0 - z) * n + z * h
        pooled_rows.append(jnp.max(h, axis=0, keepdims=True))     # (1, 2M)

    # Reassemble timestep order: output row t = [max h_fwd(t) | max h_bwd(t)].
    is_fwd_p = lax.broadcasted_iota(jnp.int32, (1, 2 * M), 1) < M
    pooled_all = jnp.concatenate(
        [jnp.where(is_fwd_p, pooled_rows[t], pooled_rows[S - 1 - t]) for t in range(S)],
        axis=0)                                                   # (S, 2M)

    # ---- Stage 3: MLP head on the pooled features (tiny; kept in f32).
    h1 = jnp.dot(pooled_all, w1_ref[...],
                 preferred_element_type=jnp.float32) + b1_ref[...]
    h1 = jnp.maximum(h1, 0.0)
    out_ref[...] = jnp.dot(h1, w2_ref[...],
                           preferred_element_type=jnp.float32) + b2_ref[...]


def pack_params(p):
    """One-time packing of PyTorch-style GRU/Linear params into kernel layout."""
    f32, bf16 = jnp.float32, jnp.bfloat16
    M = p["whh_f"].shape[1]

    def s3(a):  # split stacked [r, z, n] along axis 0
        return a[:M], a[M:2 * M], a[2 * M:]

    wir_f, wiz_f, win_f = s3(p["wih_f"])
    wir_b, wiz_b, win_b = s3(p["wih_b"])
    whr_f, whz_f, whn_f = s3(p["whh_f"])
    whr_b, whz_b, whn_b = s3(p["whh_b"])
    bir_f, biz_f, bin_f = s3(p["bih_f"])
    bir_b, biz_b, bin_b = s3(p["bih_b"])
    bhr_f, bhz_f, bhn_f = s3(p["bhh_f"])
    bhr_b, bhz_b, bhn_b = s3(p["bhh_b"])

    # Packed lane layout for all gate tensors: [f_r | b_r | f_z | b_z | f_n | b_n].
    wih_cat = jnp.concatenate(
        [wir_f.T, wir_b.T, wiz_f.T, wiz_b.T, win_f.T, win_b.T], axis=1).astype(f32)  # (D, 6M)
    # Fold the embedding into the input projection: per-token gate table (V+1, 6M).
    gate_tab = jnp.dot(p["embedding"].astype(f32), wih_cat,
                       preferred_element_type=f32)
    bgx = jnp.concatenate(
        [bir_f + bhr_f, bir_b + bhr_b, biz_f + bhz_f, biz_b + bhz_b, bin_f, bin_b]
    ).reshape(1, -1).astype(f32)                                                      # (1, 6M)
    Z = jnp.zeros((M, M), f32)
    whh_cat = jnp.concatenate([
        jnp.concatenate([whr_f.T, Z, whz_f.T, Z, whn_f.T, Z], axis=1),
        jnp.concatenate([Z, whr_b.T, Z, whz_b.T, Z, whn_b.T], axis=1)],
        axis=0).astype(bf16)                                                          # (2M, 6M)
    bhn_cat = jnp.concatenate([bhn_f, bhn_b]).reshape(1, -1).astype(f32)              # (1, 2M)

    return {
        "gate_tab": gate_tab,
        "bgx": bgx,
        "whh": whh_cat,
        "bhn": bhn_cat,
        "w1": p["w1"].T.astype(f32), "b1": p["b1"].reshape(1, -1).astype(f32),
        "w2": p["w2"].T.astype(f32), "b2": p["b2"].reshape(1, -1).astype(f32),
    }


def net_forward(x, q):
    """Pallas forward of Net. x: int32 (N0, N1); q: pack_params(...) output."""
    S, B = x.shape
    K = q["b2"].shape[1]
    x2 = x.reshape(S * B, 1).astype(jnp.int32)

    args = (x2, q["gate_tab"], q["bgx"], q["whh"], q["bhn"],
            q["w1"], q["b1"], q["w2"], q["b2"])

    return pl.pallas_call(
        _bigru_head_kernel,
        out_shape=jax.ShapeDtypeStruct((S, K), jnp.float32),
        in_specs=[pl.BlockSpec(memory_space=pltpu.MemorySpace.VMEM)] * len(args),
        out_specs=pl.BlockSpec(memory_space=pltpu.MemorySpace.VMEM),
        compiler_params=pltpu.CompilerParams(vmem_limit_bytes=32 * 1024 * 1024),
    )(*args)


def init_params(key, V, D, M, K):
    keys = jax.random.split(key, 13)
    s = 0.1
    p = {}
    p["embedding"] = jax.random.normal(keys[0], (V + 1, D), jnp.float32) * s
    p["wih_f"] = jax.random.normal(keys[1], (3 * M, D), jnp.float32) * s
    p["whh_f"] = jax.random.normal(keys[2], (3 * M, M), jnp.float32) * s
    p["bih_f"] = jax.random.normal(keys[3], (3 * M,), jnp.float32) * s
    p["bhh_f"] = jax.random.normal(keys[4], (3 * M,), jnp.float32) * s
    p["wih_b"] = jax.random.normal(keys[5], (3 * M, D), jnp.float32) * s
    p["whh_b"] = jax.random.normal(keys[6], (3 * M, M), jnp.float32) * s
    p["bih_b"] = jax.random.normal(keys[7], (3 * M,), jnp.float32) * s
    p["bhh_b"] = jax.random.normal(keys[8], (3 * M,), jnp.float32) * s
    p["w1"] = jax.random.normal(keys[9], (10, 2 * M), jnp.float32) * s
    p["b1"] = jax.random.normal(keys[10], (10,), jnp.float32) * s
    p["w2"] = jax.random.normal(keys[11], (K, 10), jnp.float32) * s
    p["b2"] = jax.random.normal(keys[12], (K,), jnp.float32) * s
    return p


def net_forward_ref(x, p):
    """Pure-JAX reference matching PyTorch semantics (for verification)."""
    emb = p["embedding"][x]
    S0, S1, _ = emb.shape
    M = p["whh_f"].shape[1]

    def cell(x_t, h, wih, whh, bih, bhh):
        gx = x_t @ wih.T + bih
        gh = h @ whh.T + bhh
        r = jax.nn.sigmoid(gx[:, :M] + gh[:, :M])
        z = jax.nn.sigmoid(gx[:, M:2 * M] + gh[:, M:2 * M])
        n = jnp.tanh(gx[:, 2 * M:] + r * gh[:, 2 * M:])
        return (1.0 - z) * n + z * h

    h = jnp.zeros((S1, M), jnp.float32)
    hf = []
    for t in range(S0):
        h = cell(emb[t], h, p["wih_f"], p["whh_f"], p["bih_f"], p["bhh_f"])
        hf.append(h)
    h = jnp.zeros((S1, M), jnp.float32)
    hb = [None] * S0
    for t in range(S0 - 1, -1, -1):
        h = cell(emb[t], h, p["wih_b"], p["whh_b"], p["bih_b"], p["bhh_b"])
        hb[t] = h
    rnn_out = jnp.concatenate([jnp.stack(hf), jnp.stack(hb)], axis=-1)  # (S0, S1, 2M)
    pooled = jnp.max(rnn_out, axis=1)
    h1 = jnp.maximum(pooled @ p["w1"].T + p["b1"], 0.0)
    return h1 @ p["w2"].T + p["b2"]


if __name__ == "__main__":
    # Net(rnn_unit='gru', V=20, T=8, K=4, D=32, M=32)
    V, D, M, K = 20, 32, 32, 4
    key = jax.random.PRNGKey(0)
    kp, kx = jax.random.split(key)
    params = init_params(kp, V, D, M, K)
    packed = pack_params(params)                                   # one-time packing
    x = jax.random.randint(kx, (2, 8), 0, V + 1, dtype=jnp.int32)  # (seq=2, "batch"=8)

    fwd = jax.jit(net_forward)
    out = fwd(x, packed)
    out = jax.block_until_ready(out)

    ref = net_forward_ref(x, params)
    # Tolerance loosened for the bf16 hidden-weight MXU path (f32 accumulation).
    np.testing.assert_allclose(np.asarray(out), np.asarray(ref), rtol=2e-2, atol=2e-2)
    print("KERNEL_OK")
</pallas_src>

<mosaic_0001>
module attributes {stable_mosaic.version = 11 : i64} {
  func.func @_bigru_head_kernel(%arg0: memref<16x1xi32, #tpu.memory_space<vmem>>, %arg1: memref<21x192xf32, #tpu.memory_space<vmem>>, %arg2: memref<1x192xf32, #tpu.memory_space<vmem>>, %arg3: memref<64x192xbf16, #tpu.memory_space<vmem>>, %arg4: memref<1x64xf32, #tpu.memory_space<vmem>>, %arg5: memref<64x10xf32, #tpu.memory_space<vmem>>, %arg6: memref<1x10xf32, #tpu.memory_space<vmem>>, %arg7: memref<10x4xf32, #tpu.memory_space<vmem>>, %arg8: memref<1x4xf32, #tpu.memory_space<vmem>>, %arg9: memref<2x4xf32, #tpu.memory_space<vmem>>) attributes {dimension_semantics = [], scalar_prefetch = 0 : i64, scratch_operands = 0 : i64, tpu.core_type = #tpu.core_type<tc>} {
    %c0 = arith.constant 0 : index
    %c0_0 = arith.constant 0 : index
    %0 = vector.load %arg0[%c0, %c0_0] : memref<16x1xi32, #tpu.memory_space<vmem>>, vector<16x1xi32>
    %1 = tpu.iota {dimensions = array<i32: 1>} : vector<16x21xi32>
    %2 = vector.broadcast %0 : vector<16x1xi32> to vector<16x21xi32>
    %3 = arith.cmpi eq, %1, %2 : vector<16x21xi32>
    %4 = arith.extui %3 : vector<16x21xi1> to vector<16x21xi32>
    %5 = arith.sitofp %4 : vector<16x21xi32> to vector<16x21xf32>
    %c0_1 = arith.constant 0 : index
    %c0_2 = arith.constant 0 : index
    %6 = vector.load %arg1[%c0_1, %c0_2] : memref<21x192xf32, #tpu.memory_space<vmem>>, vector<21x192xf32>
    %cst = arith.constant dense<0.000000e+00> : vector<16x192xf32>
    %7 = tpu.matmul %5, %6, %cst {dimension_numbers = #tpu.dot_dimension_numbers<[1], [0], [0], [1], [0, 0, 1, 1], [], []>} : vector<16x21xf32>, vector<21x192xf32>, vector<16x192xf32> -> vector<16x192xf32>
    %c0_3 = arith.constant 0 : index
    %c0_4 = arith.constant 0 : index
    %8 = vector.load %arg2[%c0_3, %c0_4] : memref<1x192xf32, #tpu.memory_space<vmem>>, vector<1x192xf32>
    %9 = vector.broadcast %8 : vector<1x192xf32> to vector<16x192xf32>
    %10 = arith.addf %7, %9 : vector<16x192xf32>
    %11 = tpu.iota {dimensions = array<i32: 1>} : vector<8x192xi32>
    %c64_i32 = arith.constant 64 : i32
    %c0_i32 = arith.constant 0 : i32
    %12 = arith.cmpi eq, %c64_i32, %c0_i32 : i32
    %c1_i32 = arith.constant 1 : i32
    %13 = arith.select %12, %c1_i32, %c64_i32 : i32
    %14 = vector.broadcast %13 : i32 to vector<8x192xi32>
    %15 = arith.remsi %11, %14 : vector<8x192xi32>
    %c0_i32_5 = arith.constant 0 : i32
    %16 = vector.broadcast %c0_i32_5 : i32 to vector<8x192xi32>
    %17 = arith.cmpi ne, %15, %16 : vector<8x192xi32>
    %c0_i32_6 = arith.constant 0 : i32
    %18 = vector.broadcast %c0_i32_6 : i32 to vector<8x192xi32>
    %19 = arith.cmpi slt, %15, %18 : vector<8x192xi32>
    %c0_i32_7 = arith.constant 0 : i32
    %20 = arith.cmpi slt, %13, %c0_i32_7 : i32
    %21 = vector.broadcast %20 : i1 to vector<8x192xi1>
    %22 = vector.broadcast %21 : vector<8x192xi1> to vector<8x192xi1>
    %23 = arith.xori %19, %22 : vector<8x192xi1>
    %24 = arith.andi %23, %17 : vector<8x192xi1>
    %25 = vector.broadcast %13 : i32 to vector<8x192xi32>
    %26 = arith.addi %15, %25 : vector<8x192xi32>
    %27 = arith.select %24, %26, %15 : vector<8x192xi1>, vector<8x192xi32>
    %c32_i32 = arith.constant 32 : i32
    %28 = vector.broadcast %c32_i32 : i32 to vector<8x192xi32>
    %29 = arith.cmpi slt, %27, %28 : vector<8x192xi32>
    %30 = vector.extract_strided_slice %10 {offsets = [0, 0], sizes = [8, 192], strides = [1, 1]} : vector<16x192xf32> to vector<8x192xf32>
    %31 = vector.extract_strided_slice %10 {offsets = [8, 0], sizes = [8, 192], strides = [1, 1]} : vector<16x192xf32> to vector<8x192xf32>
    %32 = arith.select %29, %30, %31 : vector<8x192xi1>, vector<8x192xf32>
    %33 = arith.select %29, %31, %30 : vector<8x192xi1>, vector<8x192xf32>
    %c0_8 = arith.constant 0 : index
    %c0_9 = arith.constant 0 : index
    %34 = vector.load %arg3[%c0_8, %c0_9] : memref<64x192xbf16, #tpu.memory_space<vmem>>, vector<64x192xbf16>
    %c0_10 = arith.constant 0 : index
    %c0_11 = arith.constant 0 : index
    %35 = vector.load %arg4[%c0_10, %c0_11] : memref<1x64xf32, #tpu.memory_space<vmem>>, vector<1x64xf32>
    %cst_12 = arith.constant 0.000000e+00 : f32
    %36 = vector.broadcast %cst_12 : f32 to vector<8x64xf32>
    %37 = arith.truncf %36 : vector<8x64xf32> to vector<8x64xbf16>
    %cst_13 = arith.constant dense<0.000000e+00> : vector<8x192xf32>
    %38 = tpu.matmul %37, %34, %cst_13 {dimension_numbers = #tpu.dot_dimension_numbers<[1], [0], [0], [1], [0, 0, 1, 1], [], []>} : vector<8x64xbf16>, vector<64x192xbf16>, vector<8x192xf32> -> vector<8x192xf32>
    %39 = vector.extract_strided_slice %32 {offsets = [0, 0], sizes = [8, 128], strides = [1, 1]} : vector<8x192xf32> to vector<8x128xf32>
    %40 = vector.extract_strided_slice %38 {offsets = [0, 0], sizes = [8, 128], strides = [1, 1]} : vector<8x192xf32> to vector<8x128xf32>
    %41 = arith.addf %39, %40 : vector<8x128xf32>
    %42 = arith.negf %41 : vector<8x128xf32>
    %43 = math.exp %42 : vector<8x128xf32>
    %cst_14 = arith.constant 1.000000e+00 : f32
    %44 = vector.broadcast %cst_14 : f32 to vector<8x128xf32>
    %45 = arith.addf %44, %43 : vector<8x128xf32>
    %46 = arith.divf %44, %45 : vector<8x128xf32>
    %47 = vector.extract_strided_slice %46 {offsets = [0, 0], sizes = [8, 64], strides = [1, 1]} : vector<8x128xf32> to vector<8x64xf32>
    %48 = vector.extract_strided_slice %46 {offsets = [0, 64], sizes = [8, 64], strides = [1, 1]} : vector<8x128xf32> to vector<8x64xf32>
    %49 = vector.extract_strided_slice %32 {offsets = [0, 128], sizes = [8, 64], strides = [1, 1]} : vector<8x192xf32> to vector<8x64xf32>
    %50 = vector.extract_strided_slice %38 {offsets = [0, 128], sizes = [8, 64], strides = [1, 1]} : vector<8x192xf32> to vector<8x64xf32>
    %51 = vector.broadcast %35 : vector<1x64xf32> to vector<8x64xf32>
    %52 = arith.addf %50, %51 : vector<8x64xf32>
    %53 = arith.mulf %47, %52 : vector<8x64xf32>
    %54 = arith.addf %49, %53 : vector<8x64xf32>
    %55 = math.tanh %54 : vector<8x64xf32>
    %cst_15 = arith.constant 1.000000e+00 : f32
    %56 = vector.broadcast %cst_15 : f32 to vector<8x64xf32>
    %57 = arith.subf %56, %48 : vector<8x64xf32>
    %58 = arith.mulf %57, %55 : vector<8x64xf32>
    %59 = arith.mulf %48, %36 : vector<8x64xf32>
    %60 = arith.addf %58, %59 : vector<8x64xf32>
    %cst_16 = arith.constant dense<0xFF800000> : vector<64xf32>
    %61 = vector.multi_reduction <maximumf>, %60, %cst_16 [0] : vector<8x64xf32> to vector<64xf32>
    %62 = vector.shape_cast %61 : vector<64xf32> to vector<1x64xf32>
    %63 = arith.truncf %60 : vector<8x64xf32> to vector<8x64xbf16>
    %cst_17 = arith.constant dense<0.000000e+00> : vector<8x192xf32>
    %64 = tpu.matmul %63, %34, %cst_17 {dimension_numbers = #tpu.dot_dimension_numbers<[1], [0], [0], [1], [0, 0, 1, 1], [], []>} : vector<8x64xbf16>, vector<64x192xbf16>, vector<8x192xf32> -> vector<8x192xf32>
    %65 = vector.extract_strided_slice %33 {offsets = [0, 0], sizes = [8, 128], strides = [1, 1]} : vector<8x192xf32> to vector<8x128xf32>
    %66 = vector.extract_strided_slice %64 {offsets = [0, 0], sizes = [8, 128], strides = [1, 1]} : vector<8x192xf32> to vector<8x128xf32>
    %67 = arith.addf %65, %66 : vector<8x128xf32>
    %68 = arith.negf %67 : vector<8x128xf32>
    %69 = math.exp %68 : vector<8x128xf32>
    %cst_18 = arith.constant 1.000000e+00 : f32
    %70 = vector.broadcast %cst_18 : f32 to vector<8x128xf32>
    %71 = arith.addf %70, %69 : vector<8x128xf32>
    %72 = arith.divf %70, %71 : vector<8x128xf32>
    %73 = vector.extract_strided_slice %72 {offsets = [0, 0], sizes = [8, 64], strides = [1, 1]} : vector<8x128xf32> to vector<8x64xf32>
    %74 = vector.extract_strided_slice %72 {offsets = [0, 64], sizes = [8, 64], strides = [1, 1]} : vector<8x128xf32> to vector<8x64xf32>
    %75 = vector.extract_strided_slice %33 {offsets = [0, 128], sizes = [8, 64], strides = [1, 1]} : vector<8x192xf32> to vector<8x64xf32>
    %76 = vector.extract_strided_slice %64 {offsets = [0, 128], sizes = [8, 64], strides = [1, 1]} : vector<8x192xf32> to vector<8x64xf32>
    %77 = vector.broadcast %35 : vector<1x64xf32> to vector<8x64xf32>
    %78 = arith.addf %76, %77 : vector<8x64xf32>
    %79 = arith.mulf %73, %78 : vector<8x64xf32>
    %80 = arith.addf %75, %79 : vector<8x64xf32>
    %81 = math.tanh %80 : vector<8x64xf32>
    %cst_19 = arith.constant 1.000000e+00 : f32
    %82 = vector.broadcast %cst_19 : f32 to vector<8x64xf32>
    %83 = arith.subf %82, %74 : vector<8x64xf32>
    %84 = arith.mulf %83, %81 : vector<8x64xf32>
    %85 = arith.mulf %74, %60 : vector<8x64xf32>
    %86 = arith.addf %84, %85 : vector<8x64xf32>
    %cst_20 = arith.constant dense<0xFF800000> : vector<64xf32>
    %87 = vector.multi_reduction <maximumf>, %86, %cst_20 [0] : vector<8x64xf32> to vector<64xf32>
    %88 = vector.shape_cast %87 : vector<64xf32> to vector<1x64xf32>
    %89 = tpu.iota {dimensions = array<i32: 1>} : vector<1x64xi32>
    %c32_i32_21 = arith.constant 32 : i32
    %90 = vector.broadcast %c32_i32_21 : i32 to vector<1x64xi32>
    %91 = arith.cmpi slt, %89, %90 : vector<1x64xi32>
    %92 = arith.select %91, %62, %88 : vector<1x64xi1>, vector<1x64xf32>
    %93 = arith.select %91, %88, %62 : vector<1x64xi1>, vector<1x64xf32>
    %94 = tpu.concatenate %92, %93 in 0 : vector<1x64xf32>, vector<1x64xf32> -> vector<2x64xf32>
    %c0_22 = arith.constant 0 : index
    %c0_23 = arith.constant 0 : index
    %95 = vector.load %arg5[%c0_22, %c0_23] : memref<64x10xf32, #tpu.memory_space<vmem>>, vector<64x10xf32>
    %cst_24 = arith.constant dense<0.000000e+00> : vector<2x10xf32>
    %96 = tpu.matmul %94, %95, %cst_24 {dimension_numbers = #tpu.dot_dimension_numbers<[1], [0], [0], [1], [0, 0, 1, 1], [], []>} : vector<2x64xf32>, vector<64x10xf32>, vector<2x10xf32> -> vector<2x10xf32>
    %c0_25 = arith.constant 0 : index
    %c0_26 = arith.constant 0 : index
    %97 = vector.load %arg6[%c0_25, %c0_26] : memref<1x10xf32, #tpu.memory_space<vmem>>, vector<1x10xf32>
    %98 = vector.broadcast %97 : vector<1x10xf32> to vector<2x10xf32>
    %99 = arith.addf %96, %98 : vector<2x10xf32>
    %cst_27 = arith.constant 0.000000e+00 : f32
    %100 = vector.broadcast %cst_27 : f32 to vector<2x10xf32>
    %101 = arith.maximumf %99, %100 : vector<2x10xf32>
    %c0_28 = arith.constant 0 : index
    %c0_29 = arith.constant 0 : index
    %102 = vector.load %arg7[%c0_28, %c0_29] : memref<10x4xf32, #tpu.memory_space<vmem>>, vector<10x4xf32>
    %cst_30 = arith.constant dense<0.000000e+00> : vector<2x4xf32>
    %103 = tpu.matmul %101, %102, %cst_30 {dimension_numbers = #tpu.dot_dimension_numbers<[1], [0], [0], [1], [0, 0, 1, 1], [], []>} : vector<2x10xf32>, vector<10x4xf32>, vector<2x4xf32> -> vector<2x4xf32>
    %c0_31 = arith.constant 0 : index
    %c0_32 = arith.constant 0 : index
    %104 = vector.load %arg8[%c0_31, %c0_32] : memref<1x4xf32, #tpu.memory_space<vmem>>, vector<1x4xf32>
    %105 = vector.broadcast %104 : vector<1x4xf32> to vector<2x4xf32>
    %106 = arith.addf %103, %105 : vector<2x4xf32>
    %c0_33 = arith.constant 0 : index
    %c0_34 = arith.constant 0 : index
    %107 = vector.load %arg9[%c0_33, %c0_34] : memref<2x4xf32, #tpu.memory_space<vmem>>, vector<2x4xf32>
    tpu.vector_store %arg9[%c0_33, %c0_34], %106 {strides = array<i32>} : memref<2x4xf32, #tpu.memory_space<vmem>>, vector<2x4xf32>,
    return
  }
}

</mosaic_0001>

<bundles_post_ra>
// kernel: net_forward.1
= control target key start
LH: loop header
LB: loop body
LE: loop exit
PB: predicated region body
PF: predicated region fallthrough
CT: control target
= control target key end

     0   :  { %14 = vsyncpa [#allocation3], 0  ;;  %s1073_s0 = inlined_call_operand.vmem [shape: s32[16,1], index: 0, kind: input, shape index: {}]   ;;  %s1074_s1 = inlined_call_operand.vmem [shape: f32[21,192], index: 1, kind: input, shape index: {}]   ;;  %s1075_s2 = inlined_call_operand.hbm [shape: f32[1,192], index: 2, kind: input, shape index: {}]   ;;  %s1076_s3 = inlined_call_operand.vmem [shape: bf16[64,192], index: 3, kind: input, shape index: {}]   ;;  %s1077_s4 = inlined_call_operand.vmem [shape: f32[1,64], index: 4, kind: input, shape index: {}]   ;;  %s1078_s5 = inlined_call_operand.vmem [shape: f32[64,10], index: 5, kind: input, shape index: {}]   ;;  %s1079_s6 = inlined_call_operand.hbm [shape: f32[1,10], index: 6, kind: input, shape index: {}]   ;;  %s1080_s7 = inlined_call_operand.vmem [shape: f32[10,4], index: 7, kind: input, shape index: {}]   ;;  %s1081_s8 = inlined_call_operand.hbm [shape: f32[1,4], index: 8, kind: input, shape index: {}]   ;;  %s1082_s9 = inlined_call_operand.hbm [shape: f32[2,4], index: 9, kind: output, shape index: {}]  }
   0x1   :  { %15 = vsyncpa [#allocation6], 0 }
   0x2   :  { %16 = vsyncpa [#allocation4], 0  ;;  %s846_s30 = smov [#allocation5]   ;;  %s847_s11 = smov [#allocation2]  }
   0x3   :  { %s43_s10 = sshll.u32 %s846_s30, 4  ;;  %s27_s12 = sshll.u32 %s847_s11, 4  ;;  %s44_s10 = int_to_ptr.vmem [resolvable:$true] %s43_s10  ;;  %s28_s12 = int_to_ptr.vmem [resolvable:$true] %s27_s12 }
   0x4   :  { %s752_s15 = scalar_lea.hbm %s1079_s6, 16 }
   0x5   :  { %p753_p0 = scmp.ne.s32.totalorder %s1079_s6, %s752_s15  ;;  %p756_p1 = scmp.lt.u32.totalorder %s752_s15, %s1079_s6 }
   0x7   :  { %p758_p2 = pnand %p756_p1, %p753_p0 }
   0x9   :  { %761 = shalt.err (!%p758_p2)
}
   0xa   :  { %s762_s20 = scalar_lea.vmem %s44_s10, 16  ;;  %s766_s21 = scalar_lea.vmem %s44_s10, 32 }
   0xb   :  { %p763_p3 = scmp.ne.s32.totalorder %s44_s10, %s762_s20  ;;  %p767_p4 = scmp.lt.s32.totalorder %s44_s10, %s44_s10 }
   0xc   :  { %p768_p5 = scmp.lt.s32.totalorder %s766_s21, %s762_s20 }
   0xe   :  { %p769_p6 = por %p768_p5, %p767_p4 }
  0x10   :  { %p770_p7 = pnand %p769_p6, %p763_p3 }
  0x12   :  { %773 = shalt.err (!%p770_p7)
}
  0x13   :  { %46 = dma.hbm_to_vmem [thread:$0]  %s1079_s6, 16, %s44_s10, [#allocation6]  }
  0x14   :  { %s774_s26 = scalar_lea.hbm %s1075_s2, 32 }
  0x15   :  { %p775_p8 = scmp.ne.s32.totalorder %s1075_s2, %s774_s26  ;;  %p778_p9 = scmp.lt.u32.totalorder %s774_s26, %s1075_s2 }
  0x17   :  { %p780_p10 = pnand %p778_p9, %p775_p8 }
  0x19   :  { %783 = shalt.err (!%p780_p10)
}
  0x1a   :  { %s784_s11 = scalar_lea.vmem %s28_s12, 32  ;;  %p789_p12 = scmp.lt.s32.totalorder %s28_s12, %s28_s12 }
  0x1b   :  { %p785_p11 = scmp.ne.s32.totalorder %s28_s12, %s784_s11  ;;  %p790_p13 = scmp.lt.s32.totalorder %s784_s11, %s784_s11 }
  0x1d   :  { %p791_p0 = por %p790_p13, %p789_p12 }
  0x1f   :  { %p792_p1 = pnand %p791_p0, %p785_p11 }
  0x21   :  { %795 = shalt.err (!%p792_p1)
}
  0x22   :  { %30 = dma.hbm_to_vmem [thread:$0]  %s1075_s2, 32, %s28_s12, [#allocation3]  }
  0x23   :  { %s848_s13 = smov [#allocation7]   ;;  %s796_s17 = scalar_lea.hbm %s1081_s8, 16 }
  0x24   :  { %s55_s14 = sshll.u32 %s848_s13, 4  ;;  %p797_p2 = scmp.ne.s32.totalorder %s1081_s8, %s796_s17  ;;  %s56_s14 = int_to_ptr.vmem [resolvable:$true] %s55_s14 }
  0x25   :  { %p800_p3 = scmp.lt.u32.totalorder %s796_s17, %s1081_s8 }
  0x27   :  { %p802_p4 = pnand %p800_p3, %p797_p2 }
  0x29   :  { %805 = shalt.err (!%p802_p4)
}
  0x2a   :  { %s806_s22 = scalar_lea.vmem %s56_s14, 16  ;;  %s810_s2 = scalar_lea.vmem %s56_s14, 32 }
  0x2b   :  { %p807_p5 = scmp.ne.s32.totalorder %s56_s14, %s806_s22  ;;  %p811_p6 = scmp.lt.s32.totalorder %s56_s14, %s56_s14 }
  0x2c   :  { %p812_p7 = scmp.lt.s32.totalorder %s810_s2, %s806_s22 }
  0x2e   :  { %p813_p8 = por %p812_p7, %p811_p6 }
  0x30   :  { %p814_p9 = pnand %p813_p8, %p807_p5 }
  0x32   :  { %817 = shalt.err (!%p814_p9)
}
  0x33   :  { %58 = dma.hbm_to_vmem [thread:$0]  %s1081_s8, 16, %s56_s14, [#allocation6]  }
  0x34   :  { %840 = dma.done.wait [#allocation3], 32  }
  0x35   :  { %841 = vsyncadd [#allocation3], 4294967264 }
  0x36   :  { %842 = dma.done.wait [#allocation6], 32  }
  0x37   :  { %843 = vsyncadd [#allocation6], 4294967264  ;;  %v849_v0 = vmov 0   ;;  %v850_v1 = vmov 0.0   ;;  %v69_v2 = vld [vmem:[%s1073_s0] sm:$0xff]  ;;  %v70_v3 = vld [vmem:[%s1073_s0 + $0x8] sm:$0xff]  ;;  %v71_v20 = vlaneseq }
  0x38   :  { %727 = vset.pattern.permute.xlu0 %v849_v0  ;;  %181 = vmatprep.mubr.f32.mxu0 %v850_v1  ;;  %v728_v4 = vld [vmem:[%s1076_s3 + $0x4] ss:$8 sps:$4 sm:$0xff]   ;;  %v730_v5 = vld [vmem:[%s1076_s3] ss:$8 sps:$4 sm:$0xff]   ;;  %v731_v6 = vld [vmem:[%s1076_s3 + $0x14] ss:$8 sps:$4 sm:$0xff]  }
  0x39   :  { %310 = vmatprep.mubr.bf16.mxu1 %v849_v0  ;;  %74 = vperm.xlu0 %727, %v69_v2   ;;  %v733_v7 = vld [vmem:[%s1076_s3 + $0x10] ss:$8 sps:$4 sm:$0xff]   ;;  %v86_v8 = vld [vmem:[%s1074_s1 + $0x8] sm:$0xff]  ;;  %v85_v11 = vld [vmem:[%s1074_s1] sm:$0xff]  ;;  %vm110_vm0 = vcmask 1044480   ;;  %v991_v21 = vand.u32 127, %v71_v20 }
  0x3a   :  { %278 = vmatprep.subr.bf16.mxu1 %v728_v4  ;;  %v88_v9 = vld [vmem:[%s1074_s1 + $0x18] sm:$0xff]  ;;  %v87_v12 = vld [vmem:[%s1074_s1 + $0x10] sm:$0xff]  ;;  %v734_v14 = vld [vmem:[%s1076_s3 + $0x24] ss:$8 sps:$4 sm:$0xff]   ;;  %vm103_vm1 = vcmask 171008   ;;  %v94_v30 = vshrl.u32 %v71_v20, 7 }
  0x3b   :  { %279 = vmatpush1.bf16.msra.mxu1 %v730_v5  ;;  %v697_v10 = vpack.c.bf16 %v88_v9, %v86_v8  ;;  %v699_v13 = vpack.c.bf16 %v87_v12, %v85_v11  ;;  %v90_v15 = vld [vmem:[%s1074_s1 + $0x28] sm:$0x1f]  ;;  %v89_v17 = vld [vmem:[%s1074_s1 + $0x20] sm:$0x1f]  ;;  %v737_v18 = vld [vmem:[%s1076_s3 + $0x34] ss:$8 sps:$4 sm:$0xff]  }
  0x3c   :  { %280 = vmatprep.subr.bf16.mxu1 %v731_v6  ;;  %v736_v16 = vld [vmem:[%s1076_s3 + $0x20] ss:$8 sps:$4 sm:$0xff]   ;;  %v739_v19 = vld [vmem:[%s1076_s3 + $0x30] ss:$8 sps:$4 sm:$0xff]   ;;  %v95_v31 = vsub.s32 0, %v94_v30  ;;  %v99_v33 = vsub.s32 1, %v94_v30 }
  0x3d   :  { %77 = vperm.xlu0 %727, %v70_v3   ;;  %698 = vmatprep.subr.bf16.mxu0 %v697_v10  ;;  %v91_v32 = vld [vmem:[#allocation2] sm:$0x3]  ;;  %v194_v35 = vadd.s32 128, %v991_v21  ;;  %v199_v38 = vand.u32 63, %v991_v21  ;;  %v651_v57 = vld [vmem:[%s1077_s4] ss:$0 sm:$0xff] }
  0x3e   :  { %700 = vmatpush1.bf16.msra.mxu0 %v699_v13  ;;  %v96_v34 = vrot.slane %v91_v32, %v95_v31  ;;  %v100_v36 = vrot.slane %v91_v32, %v99_v33  ;;  %s851_s30 = smov 64   ;;  %vm344_vm6 = vcmask 1048064   ;;  %vm274_vm7 = vcmask 523264   ;;  %v444_v30 = vld [vmem:[%s1078_s5 + $0x10] sm:$0xff]  ;;  %v445_v33 = vld [vmem:[%s1078_s5 + $0x18] sm:$0xff] }
  0x3f   :  { %281 = vmatpush1.bf16.msra.mxu1 %v733_v7  ;;  %638 = vmatprep.subr.msk.mxu0 %vm110_vm0, %v90_v15  ;;  %v206_v41 = vand.u32 63, %v194_v35  ;;  %vm1000_vm4 = vcmp.lt.s32.totalorder %v199_v38, 32  ;;  %v852_v31 = vmov 0.0|0.0   ;;  %v446_v35 = vld [vmem:[%s1078_s5 + $0x20] sm:$0xff]  ;;  %v449_v44 = vld [vmem:[%s1078_s5 + $0x38] sm:$0xff]  ;;  %vm853_vm8 = vmmov 0  }
  0x40   :  { %282 = vmatprep.subr.bf16.mxu1 %v734_v14  ;;  %vm544_vm9 = vcmask 1041408   ;;  %vm854_vm10 = vmmov 1   ;;  %vm426_vm12 = vcmp.lt.s32.totalorder %v991_v21, 32  ;;  %vm440_vm13 = vcmask 1040384  }
  0x41   :  { %vm1004_vm5 = vcmp.lt.s32.totalorder %v206_v41, 32  ;;  %vm715_vm11 = vmpackc.low %vm544_vm9, %vm854_vm10  ;;  %vm540_vm14 = vcmask 80896   ;;  %vm618_vm15 = vcmask 25600  }
  0x42   :  { %639 = vmatpush1.msk.msra.mxu0 %vm110_vm0, %v89_v17 }
  0x43   :  { %283 = vmatpush1.bf16.msra.mxu1 %v736_v16  ;;  %359 = vmatprep.subr.bf16.mxu0 %v728_v4 }
  0x44   :  { %284 = vmatprep.subr.bf16.mxu1 %v737_v18 }
  0x47   :  { %285 = vmatpush1.bf16.msra.mxu1 %v739_v19 }
  0x48   :  { %701 = vmatprep.subr.bf16.mxu1 %v852_v31 }
  0x4a   :  { %311 = vmatmul.mubr.bf16.vlgmr.msra.gmra.mrb[0].mxu1 %v849_v0 }
  0x4b   :  { %687 = vmatprep.mubr.msk.f32.mxu1 %vm853_vm8, %v850_v1 }
  0xb8   :  { %v75_v22 = vpop.permute.xlu0 %74 }
  0xb9   :  { %vm79_vm2 = vcmp.eq.s32.totalorder %v991_v21, %v75_v22 }
  0xba   :  { %v636_v23 = vsel %vm79_vm2, 1.0, %v850_v1 }
  0xbb   :  { %640 = vmatmul.mubr.msk.f32.vlgmr.msra.gmra.mrb[0].mxu0 %vm103_vm1, %v636_v23 }
  0xbc   :  { %v78_v24 = vpop.permute.xlu0 %77  ;;  %187 = vmatprep.mubr.f32.mxu0 %v850_v1  ;;  %360 = vmatpush1.bf16.msra.mxu0 %v730_v5 }
  0xbd   :  { %vm80_vm3 = vcmp.eq.s32.totalorder %v991_v21, %v78_v24  ;;  %361 = vmatprep.subr.bf16.mxu0 %v731_v6 }
  0xbe   :  { %v637_v25 = vsel %vm80_vm3, 1.0, %v850_v1 }
  0xbf   :  { %641 = vmatmul.mubr.msk.f32.gmra.mrb[2].mxu0 %vm103_vm1, %v637_v25 }
  0xc0   :  { %362 = vmatpush1.bf16.msra.mxu0 %v733_v7  ;;  %391 = vmatprep.mubr.bf16.mxu0 %v849_v0 }
  0xc1   :  { %363 = vmatprep.subr.bf16.mxu0 %v734_v14 }
  0xc4   :  { %364 = vmatpush1.bf16.msra.mxu0 %v736_v16 }
  0xc5   :  { %365 = vmatprep.subr.bf16.mxu0 %v737_v18 }
  0xc8   :  { %366 = vmatpush1.bf16.msra.mxu0 %v739_v19 }
  0xc9   :  { %713 = vmatprep.subr.bf16.mxu0 %v852_v31 }
 0x11d   :  { %v312_v26 = vpop.f32.mrb[0].mxu1 }
 0x11e   :  { %v314_v27 = vpop.f32.mrb[1].mxu1 }
 0x11f   :  { %v316_v28 = vpop.f32.mrb[2].mxu1  ;;  %v332_v58 = vadd.f32 %v651_v57, %v314_v27 }
 0x120   :  { %v317_v29 = vpop.f32.mrb[3].mxu1  ;;  %v442_v28 = vld [vmem:[%s1078_s5] sm:$0xff] }
 0x121   :  { %v443_v29 = vld [vmem:[%s1078_s5 + $0x8] sm:$0xff] }
 0x122   :  { %v702_v32 = vpack.c.bf16 %v443_v29, %v442_v28 }
 0x124   :  { %703 = vmatpush3.bf16.msra.mxu1 %v702_v32 }
 0x125   :  { %704 = vmatprep.subr.bf16.mxu1 %v852_v31 }
 0x18e   :  { %v183_v37 = vpop.f32.mrb[0].mxu0 }
 0x18f   :  { %v184_v39 = vadd.f32 %v183_v37, %v96_v34  ;;  %v185_v40 = vpop.f32.mrb[1].mxu0 }
 0x190   :  { %v186_v42 = vadd.f32 %v185_v40, %v100_v36 }
 0x192   :  { %v189_v43 = vpop.f32.mrb[2].mxu0 }
 0x193   :  { %v190_v45 = vadd.f32 %v189_v43, %v96_v34  ;;  %v191_v46 = vpop.f32.mrb[3].mxu0  ;;  %v705_v34 = vpack.c.bf16 %v445_v33, %v444_v30  ;;  %v448_v43 = vld [vmem:[%s1078_s5 + $0x30] sm:$0xff] }
 0x194   :  { %v192_v48 = vadd.f32 %v191_v46, %v100_v36  ;;  %v447_v36 = vld [vmem:[%s1078_s5 + $0x28] sm:$0xff]  ;;  %s855_s5 = smov [#allocation8]  }
 0x195   :  { %v221_v49 = vsel %vm1000_vm4, %v184_v39, %v190_v45  ;;  %v223_v50 = vsel %vm1000_vm4, %v190_v45, %v184_v39  ;;  %706 = vmatpush3.bf16.msra.mxu1 %v705_v34  ;;  %v708_v37 = vpack.c.bf16 %v447_v36, %v446_v35  ;;  %v711_v45 = vpack.c.bf16 %v449_v44, %v448_v43 }
 0x196   :  { %v319_v51 = vadd.f32 %v312_v26, %v221_v49  ;;  %v222_v52 = vsel %vm1004_vm5, %v186_v42, %v192_v48  ;;  %v224_v53 = vsel %vm1004_vm5, %v192_v48, %v186_v42  ;;  %707 = vmatprep.subr.bf16.mxu1 %v852_v31  ;;  %v531_v49 = vld [vmem:[%s1080_s7] sm:$0xff] }
 0x198   :  { %v650_v54 = vmul.f32 -1.442695, %v319_v51 }
 0x199   :  { %709 = vmatpush3.bf16.msra.mxu1 %v708_v37 }
 0x19a   :  { %740 = vpow2.f32 %v650_v54  ;;  %710 = vmatprep.subr.bf16.mxu1 %v852_v31 }
 0x19d   :  { %712 = vmatpush3.bf16.msra.mxu1 %v711_v45 }
 0x1a4   :  { %v741_v55 = vpop.eup %740 }
 0x1a5   :  { %v323_v56 = vadd.f32 1.0, %v741_v55 }
 0x1a7   :  { %742 = vrcp.f32 %v323_v56 }
 0x1b1   :  { %v743_v59 = vpop.eup %742 }
 0x1b2   :  { %v333_v60 = vmul.f32 %v743_v59, %v332_v58  ;;  %v336_v63 = vsub.f32 1.0, %v743_v59  ;;  %v342_v2 = vmul.f32 0.0, %v743_v59 }
 0x1b4   :  { %v334_v61 = vadd.f32 %v333_v60, %v222_v52 }
 0x1b6   :  { %744 = vtanh.f32 %v334_v61  ;;  %v654_v61 = vld [vmem:[#allocation5] ss:$0 sm:$0xff] }
 0x1c0   :  { %v745_v62 = vpop.eup %744 }
 0x1c1   :  { %338 = vrot.lane.b32.xlu1 %v745_v62, %s851_s30 }
 0x233   :  { %v339_v0 = vpop.permute.xlu1 %338 }
 0x234   :  { %v341_v3 = vmul.f32 %v339_v0, %v336_v63 }
 0x236   :  { %v343_v4 = vadd.f32 %v342_v2, %v341_v3  ;;  %v656_v3 = vld [vmem:[#allocation7] ss:$0 sm:$0xff] }
 0x238   :  { %v345_v5 = vsel %vm344_vm6, %v343_v4, -inf  ;;  %v352_v6 = vpack.c.bf16 %v343_v4, %v343_v4 }
 0x239   :  { %v346_v7 = vrot.slane %v345_v5, 4 }
 0x23a   :  { %354 = vrot.lane.b32.xlu1 %v352_v6, %s851_s30 }
 0x23b   :  { %v347_v8 = vmax.f32 %v345_v5, %v346_v7 }
 0x23d   :  { %v348_v9 = vrot.slane %v347_v8, 2 }
 0x23f   :  { %v349_v10 = vmax.f32 %v347_v8, %v348_v9 }
 0x241   :  { %v350_v11 = vrot.slane %v349_v10, 1 }
 0x243   :  { %v351_v12 = vmax.f32 %v349_v10, %v350_v11 }
 0x245   :  { %428 = vrot.lane.b32.xlu1 %v351_v12, %s851_s30 }
 0x2ac   :  { %v355_v13 = vpop.permute.xlu1 %354 }
 0x2ad   :  { %652 = vmatmul.mubr.msk.bf16.vlgmr.msra.gmra.mrb[4].mxu0 %vm274_vm7, %v355_v13 }
 0x2ae   :  { %694 = vmatprep.mubr.msk.f32.mxu0 %vm853_vm8, %v850_v1 }
 0x2b7   :  { %v429_v1 = vpop.permute.xlu1 %428 }
 0x380   :  { %v393_v14 = vpop.f32.mrb[4].mxu0 }
 0x381   :  { %v400_v15 = vadd.f32 %v393_v14, %v223_v50  ;;  %v395_v16 = vpop.f32.mrb[5].mxu0  ;;  %v532_v50 = vld [vmem:[%s1080_s7 + $0x8] sm:$0x3]  ;;  %s626_s7 = sshll.u32 %s855_s5, 4  ;;  %s627_s7 = int_to_ptr.vmem [resolvable:$true] %s626_s7 }
 0x382   :  { %v397_v17 = vpop.f32.mrb[6].mxu0  ;;  %v407_v23 = vadd.f32 %v651_v57, %v395_v16  ;;  %v714_v52 = vpack.c.bf16 %v532_v50, %v531_v49  ;;  %s818_s26 = scalar_lea.vmem %s627_s7, 32  ;;  %p823_p11 = scmp.lt.s32.totalorder %s627_s7, %s627_s7 }
 0x383   :  { %v653_v18 = vmul.f32 -1.442695, %v400_v15  ;;  %v398_v19 = vpop.f32.mrb[7].mxu0  ;;  %p819_p10 = scmp.ne.s32.totalorder %s627_s7, %s818_s26  ;;  %p824_p12 = scmp.lt.s32.totalorder %s818_s26, %s818_s26 }
 0x384   :  { %716 = vmatpush3.bf16.msk.msra.mxu0 %vm715_vm11, %v714_v52 }
 0x385   :  { %746 = vpow2.f32 %v653_v18  ;;  %p825_p13 = por %p824_p12, %p823_p11 }
 0x387   :  { %p826_p0 = pnand %p825_p13, %p819_p10 }
 0x38f   :  { %v747_v20 = vpop.eup %746 }
 0x390   :  { %v404_v22 = vadd.f32 1.0, %v747_v20 }
 0x392   :  { %748 = vrcp.f32 %v404_v22 }
 0x39c   :  { %v749_v24 = vpop.eup %748 }
 0x39d   :  { %v408_v25 = vmul.f32 %v749_v24, %v407_v23  ;;  %v411_v38 = vsub.f32 1.0, %v749_v24  ;;  %v417_v40 = vmul.f32 %v749_v24, %v343_v4 }
 0x39f   :  { %v409_v26 = vadd.f32 %v408_v25, %v224_v53 }
 0x3a1   :  { %750 = vtanh.f32 %v409_v26 }
 0x3ab   :  { %v751_v27 = vpop.eup %750 }
 0x3ac   :  { %413 = vrot.lane.b32.xlu0 %v751_v27, %s851_s30 }
 0x41e   :  { %v414_v39 = vpop.permute.xlu0 %413 }
 0x41f   :  { %v416_v41 = vmul.f32 %v414_v39, %v411_v38 }
 0x421   :  { %v418_v42 = vadd.f32 %v417_v40, %v416_v41 }
 0x423   :  { %v419_v46 = vsel %vm344_vm6, %v418_v42, -inf }
 0x424   :  { %v420_v47 = vrot.slane %v419_v46, 4 }
 0x426   :  { %v421_v48 = vmax.f32 %v419_v46, %v420_v47 }
 0x428   :  { %v422_v51 = vrot.slane %v421_v48, 2 }
 0x42a   :  { %v423_v53 = vmax.f32 %v421_v48, %v422_v51 }
 0x42c   :  { %v424_v54 = vrot.slane %v423_v53, 1 }
 0x42e   :  { %v425_v55 = vmax.f32 %v423_v53, %v424_v54 }
 0x430   :  { %432 = vrot.lane.b32.xlu0 %v425_v55, %s851_s30 }
 0x4a2   :  { %v433_v56 = vpop.permute.xlu0 %432 }
 0x4a3   :  { %v436_v57 = vsel %vm426_vm12, %v433_v56, %v429_v1  ;;  %v435_v59 = vsel %vm426_vm12, %v429_v1, %v433_v56 }
 0x4a4   :  { %v438_v58 = vrot.slane %v436_v57, 7 }
 0x4a6   :  { %v441_v60 = vsel %vm440_vm13, %v435_v59, %v438_v58 }
 0x4a7   :  { %688 = vmatmul.mubr.msk.f32.vlgmr.msra.gmra.mrb[4].mxu1 %vm274_vm7, %v441_v60 }
 0x57a   :  { %v526_v62 = vpop.f32.mrb[4].mxu1 }
 0x57b   :  { %v527_v63 = vadd.f32 %v654_v61, %v526_v62  ;;  %v689_v0 = vpop.f32.mrb[5].mxu1 }
 0x57d   :  { %v530_v2 = vmax.f32 %v527_v63, 0.0 }
 0x57f   :  { %695 = vmatmul.mubr.msk.f32.vlgmr.msra.gmra.mrb[8].mxu0 %vm540_vm14, %v530_v2 }
 0x652   :  { %v614_v21 = vpop.f32.mrb[8].mxu0 }
 0x653   :  { %v615_v4 = vadd.f32 %v656_v3, %v614_v21  ;;  %v696_v5 = vpop.f32.mrb[9].mxu0 }
 0x655   :  { %619 = vst.msk [vmem:[#allocation8] sm:$0x3] %vm618_vm15, %v615_v4 }
 0x656   :  { %829 = shalt.err (!%p826_p0)
}
 0x657   :  { %s830_s28 = scalar_lea.hbm %s1082_s9, 32 }
 0x658   :  { %p831_p1 = scmp.ne.s32.totalorder %s1082_s9, %s830_s28  ;;  %p834_p2 = scmp.lt.u32.totalorder %s830_s28, %s1082_s9 }
 0x65a   :  { %p836_p3 = pnand %p834_p2, %p831_p1 }
 0x65c   :  { %839 = shalt.err (!%p836_p3)
}
 0x65d   :  { %629 = dma.vmem_to_hbm [thread:$0]  %s627_s7, 32, %s1082_s9, [#allocation4]  }
 0x65e   :  { %844 = dma.done.wait [#allocation4], 32  }
 0x65f   :  { %845 = vsyncadd [#allocation4], 4294967264 }
 0x660   :  { %633 = vsyncpa [#allocation3], 1 }
 0x661   :  { %634 = vsyncpa [#allocation6], 1 }
 0x662   :  { %635 = vsyncpa [#allocation4], 1 }

</bundles_post_ra>
